<compile_context>
chip_gen: v6e
topology: v6e:2x2x1
jax: 0.10.0
libtpu: 0.0.40
codegen_flags: <defaults>
</compile_context>

<pallas_src>
import functools

import jax
import jax.numpy as jnp
from jax.experimental import pallas as pl
from jax.experimental.pallas import tpu as pltpu

_LANES = 128
_SUBLANES = 8
# (1024, 128) f32 tile = 512 KiB per input; 2 inputs x 2 pipeline buffers
# = 2 MiB of VMEM -- well under the scoped default on v5e/v6e/v7x.
_MAX_TILE_ROWS = 1024


def _iou_partial_kernel(x_ref, t_ref, o_ref, *, n, tile_rows, needs_mask):
    """Per-tile partial sums of sigmoid(x), t, and sigmoid(x)*t."""
    xf = x_ref[...].astype(jnp.float32)
    tf = t_ref[...].astype(jnp.float32)

    # sigmoid(x) = 0.5 * tanh(0.5 * x) + 0.5 -> one EUP op per element
    # (instead of exp + divide), keeps the kernel HBM-bound on v7x.
    p = 0.5 * jnp.tanh(0.5 * xf) + 0.5

    if needs_mask:
        # Zero out the zero-padded tail (sigmoid(0) = 0.5 would otherwise
        # leak into sum_p).  In-kernel masking replaces the old full-size
        # host-side pad-and-copy of both inputs.
        i = pl.program_id(0)
        row = jax.lax.broadcasted_iota(jnp.int32, (tile_rows, _LANES), 0)
        col = jax.lax.broadcasted_iota(jnp.int32, (tile_rows, _LANES), 1)
        idx = (i * tile_rows + row) * _LANES + col
        mask = idx < n
        p = jnp.where(mask, p, 0.0)
        tf = jnp.where(mask, tf, 0.0)

    # Reduce only along the leading axis: pure VPU vreg adds, no per-tile
    # cross-lane (XLU) reduction.  FP/FN-style terms are derived later from
    # sum_p / sum_t / sum_pt, so no extra per-element multiplies/subtracts.
    k = tile_rows // _SUBLANES
    sum_p = jnp.sum(p.reshape(k, _SUBLANES, _LANES), axis=0)
    sum_t = jnp.sum(tf.reshape(k, _SUBLANES, _LANES), axis=0)
    sum_pt = jnp.sum((p * tf).reshape(k, _SUBLANES, _LANES), axis=0)

    o_ref[0, 0, :, :] = sum_p
    o_ref[0, 1, :, :] = sum_t
    o_ref[0, 2, :, :] = sum_pt


def iou_loss(inputs, targets, smooth=1.0):
    """Pallas TPU implementation of IoULoss.forward."""
    n = inputs.size
    if n == 0:
        # sums are all zero -> IoU = smooth / smooth = 1 -> loss = 0
        return jnp.float32(0.0)

    # Keep native dtypes in HBM; casting to f32 happens inside the kernel.
    x = inputs.reshape(-1)
    t = targets.reshape(-1)

    rows = pl.cdiv(n, _LANES)
    rows = pl.cdiv(rows, _SUBLANES) * _SUBLANES
    tile_rows = min(_MAX_TILE_ROWS, rows)
    padded_rows = pl.cdiv(rows, tile_rows) * tile_rows
    n_pad = padded_rows * _LANES
    num_tiles = padded_rows // tile_rows
    needs_mask = n_pad != n

    if needs_mask:
        # Pad only the tail (cheap); the kernel masks the padded elements.
        x = jnp.pad(x, (0, n_pad - n))
        t = jnp.pad(t, (0, n_pad - n))

    x2d = x.reshape(padded_rows, _LANES)
    t2d = t.reshape(padded_rows, _LANES)

    kernel = functools.partial(
        _iou_partial_kernel,
        n=n,                     # plain Python ints/bool -> compile-time consts
        tile_rows=tile_rows,
        needs_mask=needs_mask,
    )

    partials = pl.pallas_call(
        kernel,
        out_shape=jax.ShapeDtypeStruct(
            (num_tiles, 3, _SUBLANES, _LANES), jnp.float32),
        grid_spec=pltpu.PrefetchScalarGridSpec(
            num_scalar_prefetch=0,
            grid=(num_tiles,),
            in_specs=[
                pl.BlockSpec((tile_rows, _LANES), lambda i: (i, 0)),
                pl.BlockSpec((tile_rows, _LANES), lambda i: (i, 0)),
            ],
            out_specs=pl.BlockSpec((1, 3, _SUBLANES, _LANES),
                                   lambda i: (i, 0, 0, 0)),
        ),
        compiler_params=pltpu.CompilerParams(
            dimension_semantics=("parallel",),
        ),
    )(x2d, t2d)

    sums = jnp.sum(partials, axis=(0, 2, 3))          # (3,) tiny final reduce
    sum_p, sum_t, intersection = sums[0], sums[1], sums[2]
    total = sum_p + sum_t
    union = total - intersection
    iou = (intersection + smooth) / (union + smooth)
    return 1.0 - iou


def _reference(inputs, targets, smooth=1.0):
    p = jax.nn.sigmoid(inputs.astype(jnp.float32)).reshape(-1)
    t = targets.astype(jnp.float32).reshape(-1)
    intersection = jnp.sum(p * t)
    total = jnp.sum(p + t)
    union = total - intersection
    iou = (intersection + smooth) / (union + smooth)
    return 1.0 - iou


if __name__ == "__main__":
    key = jax.random.PRNGKey(0)
    k1, k2, k3, k4 = jax.random.split(key, 4)

    # NCHW inputs matching typical segmentation-logit / binary-mask shapes.
    inputs = jax.random.normal(k1, (2, 4, 16, 16), dtype=jnp.float32)
    targets = (jax.random.uniform(k2, (2, 4, 16, 16)) > 0.5).astype(jnp.float32)

    loss = jax.block_until_ready(iou_loss(inputs, targets, smooth=1.0))
    ref = _reference(inputs, targets, smooth=1.0)
    assert jnp.allclose(loss, ref, rtol=1e-5, atol=1e-5), (loss, ref)

    # Ragged size to exercise the in-kernel tail masking path.
    inputs2 = jax.random.normal(k3, (2, 3, 15, 17), dtype=jnp.float32)
    targets2 = (jax.random.uniform(k4, (2, 3, 15, 17)) > 0.5).astype(jnp.float32)

    loss2 = jax.block_until_ready(iou_loss(inputs2, targets2, smooth=1.0))
    ref2 = _reference(inputs2, targets2, smooth=1.0)
    assert jnp.allclose(loss2, ref2, rtol=1e-5, atol=1e-5), (loss2, ref2)

    print("KERNEL_OK")
</pallas_src>

<mosaic_0001>
module attributes {stable_mosaic.version = 11 : i64} {
  func.func @_iou_partial_kernel(%arg0: i32, %arg1: memref<16x128xf32, #tpu.memory_space<vmem>>, %arg2: memref<16x128xf32, #tpu.memory_space<vmem>>, %arg3: memref<1x3x8x128xf32, #tpu.memory_space<vmem>>) attributes {dimension_semantics = [#tpu.dimension_semantics<parallel>], iteration_bounds = array<i64: 1>, scalar_prefetch = 0 : i64, scratch_operands = 0 : i64, tpu.core_type = #tpu.core_type<tc>, window_params = [{transform_indices = @transform_0, window_bounds = array<i64: 16, 128>}, {transform_indices = @transform_1, window_bounds = array<i64: 16, 128>}, {transform_indices = @transform_2, window_bounds = array<i64: 1, 3, 8, 128>}]} {
    %c0 = arith.constant 0 : index
    %c0_0 = arith.constant 0 : index
    %0 = vector.load %arg1[%c0, %c0_0] : memref<16x128xf32, #tpu.memory_space<vmem>>, vector<16x128xf32>
    %c0_1 = arith.constant 0 : index
    %c0_2 = arith.constant 0 : index
    %1 = vector.load %arg2[%c0_1, %c0_2] : memref<16x128xf32, #tpu.memory_space<vmem>>, vector<16x128xf32>
    %cst = arith.constant 5.000000e-01 : f32
    %2 = vector.broadcast %cst : f32 to vector<16x128xf32>
    %3 = arith.mulf %2, %0 : vector<16x128xf32>
    %4 = math.tanh %3 : vector<16x128xf32>
    %cst_3 = arith.constant 5.000000e-01 : f32
    %5 = vector.broadcast %cst_3 : f32 to vector<16x128xf32>
    %6 = arith.mulf %5, %4 : vector<16x128xf32>
    %cst_4 = arith.constant 5.000000e-01 : f32
    %7 = vector.broadcast %cst_4 : f32 to vector<16x128xf32>
    %8 = arith.addf %6, %7 : vector<16x128xf32>
    %9 = vector.shape_cast %8 : vector<16x128xf32> to vector<2x8x128xf32>
    %cst_5 = arith.constant dense<0.000000e+00> : vector<8x128xf32>
    %10 = vector.multi_reduction <add>, %9, %cst_5 [0] : vector<2x8x128xf32> to vector<8x128xf32>
    %11 = vector.shape_cast %1 : vector<16x128xf32> to vector<2x8x128xf32>
    %cst_6 = arith.constant dense<0.000000e+00> : vector<8x128xf32>
    %12 = vector.multi_reduction <add>, %11, %cst_6 [0] : vector<2x8x128xf32> to vector<8x128xf32>
    %13 = arith.mulf %8, %1 : vector<16x128xf32>
    %14 = vector.shape_cast %13 : vector<16x128xf32> to vector<2x8x128xf32>
    %cst_7 = arith.constant dense<0.000000e+00> : vector<8x128xf32>
    %15 = vector.multi_reduction <add>, %14, %cst_7 [0] : vector<2x8x128xf32> to vector<8x128xf32>
    %c0_8 = arith.constant 0 : index
    %c0_9 = arith.constant 0 : index
    %c0_10 = arith.constant 0 : index
    %c0_11 = arith.constant 0 : index
    %16 = vector.load %arg3[%c0_8, %c0_9, %c0_10, %c0_11] : memref<1x3x8x128xf32, #tpu.memory_space<vmem>>, vector<1x1x8x128xf32>
    %17 = vector.shape_cast %16 : vector<1x1x8x128xf32> to vector<8x128xf32>
    %18 = vector.shape_cast %10 : vector<8x128xf32> to vector<1x1x8x128xf32>
    tpu.vector_store %arg3[%c0_8, %c0_9, %c0_10, %c0_11], %18 {strides = array<i32>} : memref<1x3x8x128xf32, #tpu.memory_space<vmem>>, vector<1x1x8x128xf32>,
    %c0_12 = arith.constant 0 : index
    %c1 = arith.constant 1 : index
    %c0_13 = arith.constant 0 : index
    %c0_14 = arith.constant 0 : index
    %19 = vector.load %arg3[%c0_12, %c1, %c0_13, %c0_14] : memref<1x3x8x128xf32, #tpu.memory_space<vmem>>, vector<1x1x8x128xf32>
    %20 = vector.shape_cast %19 : vector<1x1x8x128xf32> to vector<8x128xf32>
    %21 = vector.shape_cast %12 : vector<8x128xf32> to vector<1x1x8x128xf32>
    tpu.vector_store %arg3[%c0_12, %c1, %c0_13, %c0_14], %21 {strides = array<i32>} : memref<1x3x8x128xf32, #tpu.memory_space<vmem>>, vector<1x1x8x128xf32>,
    %c0_15 = arith.constant 0 : index
    %c2 = arith.constant 2 : index
    %c0_16 = arith.constant 0 : index
    %c0_17 = arith.constant 0 : index
    %22 = vector.load %arg3[%c0_15, %c2, %c0_16, %c0_17] : memref<1x3x8x128xf32, #tpu.memory_space<vmem>>, vector<1x1x8x128xf32>
    %23 = vector.shape_cast %22 : vector<1x1x8x128xf32> to vector<8x128xf32>
    %24 = vector.shape_cast %15 : vector<8x128xf32> to vector<1x1x8x128xf32>
    tpu.vector_store %arg3[%c0_15, %c2, %c0_16, %c0_17], %24 {strides = array<i32>} : memref<1x3x8x128xf32, #tpu.memory_space<vmem>>, vector<1x1x8x128xf32>,
    return
  }
  func.func @transform_0(%arg0: i32) -> (i32, i32) {
    %c0_i32 = arith.constant 0 : i32
    %c0_i32_0 = arith.constant 0 : i32
    return %arg0, %c0_i32 : i32, i32
  }
  func.func @transform_1(%arg0: i32) -> (i32, i32) {
    %c0_i32 = arith.constant 0 : i32
    %c0_i32_0 = arith.constant 0 : i32
    return %arg0, %c0_i32 : i32, i32
  }
  func.func @transform_2(%arg0: i32) -> (i32, i32, i32, i32) {
    %c0_i32 = arith.constant 0 : i32
    %c0_i32_0 = arith.constant 0 : i32
    %c0_i32_1 = arith.constant 0 : i32
    %c0_i32_2 = arith.constant 0 : i32
    return %arg0, %c0_i32, %c0_i32_0, %c0_i32_1 : i32, i32, i32, i32
  }
}

</mosaic_0001>

<bundles_post_ra>
// kernel: tpu_custom_call.1
= control target key start
LH: loop header
LB: loop body
LE: loop exit
PB: predicated region body
PF: predicated region fallthrough
CT: control target
= control target key end

     0   :  { %7 = vsyncpa [#allocation3], 0  ;;  %s193_s0 = inlined_call_operand.hbm [shape: f32[16,128], index: 0, kind: input, shape index: {}]   ;;  %s194_s1 = inlined_call_operand.hbm [shape: f32[16,128], index: 1, kind: input, shape index: {}]   ;;  %s195_s2 = inlined_call_operand.hbm [shape: f32[1,3,8,128], index: 2, kind: output, shape index: {}]  }
   0x1   :  { %8 = vsyncpa [#allocation6], 0 }
   0x2   :  { %9 = vsyncpa [#allocation4], 0  ;;  %s155_s9 = smov [#allocation2]  }
   0x3   :  { %s15_s10 = sshll.u32 %s155_s9, 4  ;;  %s16_s10 = int_to_ptr.vmem [resolvable:$true] %s15_s10 }
   0x4   :  { %s97_s11 = scalar_lea.vmem %s16_s10, 256  ;;  %p102_p1 = scmp.lt.s32.totalorder %s16_s10, %s16_s10 }
   0x5   :  { %p98_p0 = scmp.ne.s32.totalorder %s16_s10, %s97_s11  ;;  %p103_p2 = scmp.lt.s32.totalorder %s97_s11, %s97_s11 }
   0x7   :  { %p104_p3 = por %p103_p2, %p102_p1 }
   0x9   :  { %p105_p4 = pnand %p104_p3, %p98_p0 }
   0xb   :  { %108 = shalt.err (!%p105_p4)
}
   0xc   :  { %s156_s12 = smov 128   ;;  %s157_s13 = smov 8  }
   0xd   :  { %21 = dma.hbm_to_vmem [thread:$0]  %s193_s0, 256, %s16_s10, [#allocation3], %s156_s12, %s156_s12, %s157_s13  }
   0xe   :  { %s158_s16 = smov [#allocation5]  }
   0xf   :  { %s27_s17 = sshll.u32 %s158_s16, 4  ;;  %s28_s17 = int_to_ptr.vmem [resolvable:$true] %s27_s17 }
  0x10   :  { %s117_s18 = scalar_lea.vmem %s28_s17, 256  ;;  %p122_p6 = scmp.lt.s32.totalorder %s28_s17, %s28_s17 }
  0x11   :  { %p118_p5 = scmp.ne.s32.totalorder %s28_s17, %s117_s18  ;;  %p123_p7 = scmp.lt.s32.totalorder %s117_s18, %s117_s18 }
  0x13   :  { %p124_p8 = por %p123_p7, %p122_p6 }
  0x15   :  { %p125_p9 = pnand %p124_p8, %p118_p5 }
  0x17   :  { %128 = shalt.err (!%p125_p9)
}
  0x18   :  { %33 = dma.hbm_to_vmem [thread:$0]  %s194_s1, 256, %s28_s17, [#allocation6], %s156_s12, %s156_s12, %s157_s13  }
  0x19   :  { %149 = dma.done.wait [#allocation3], 256  }
  0x1a   :  { %150 = vsyncadd [#allocation3], 4294967040 }
  0x1b   :  { %151 = dma.done.wait [#allocation6], 256  }
  0x1c   :  { %152 = vsyncadd [#allocation6], 4294967040  ;;  %v40_v0 = vld [vmem:[#allocation2] sm:$0xff]  ;;  %v41_v1 = vld [vmem:[#allocation2 + $0x8] sm:$0xff]  ;;  %s159_s0 = smov [#allocation7]  }
  0x1d   :  { %v44_v2 = vmul.f32 0.5, %v40_v0  ;;  %v45_v3 = vmul.f32 0.5, %v41_v1  ;;  %v42_v4 = vld [vmem:[#allocation5] sm:$0xff]  ;;  %v43_v5 = vld [vmem:[#allocation5 + $0x8] sm:$0xff]  ;;  %s67_s1 = sshll.u32 %s159_s0, 4  ;;  %s68_s1 = int_to_ptr.vmem [resolvable:$true] %s67_s1 }
  0x1e   :  { %v53_v6 = vadd.f32 %v43_v5, %v42_v4  ;;  %s129_s21 = scalar_lea.vmem %s68_s1, 384  ;;  %p134_p11 = scmp.lt.s32.totalorder %s68_s1, %s68_s1 }
  0x1f   :  { %85 = vtanh.f32 %v44_v2  ;;  %p130_p10 = scmp.ne.s32.totalorder %s68_s1, %s129_s21  ;;  %p135_p12 = scmp.lt.s32.totalorder %s129_s21, %s129_s21 }
  0x20   :  { %87 = vtanh.f32 %v45_v3  ;;  %59 = vst [vmem:[#allocation7 + $0x8] sm:$0xff] %v53_v6 }
  0x21   :  { %p136_p13 = por %p135_p12, %p134_p11 }
  0x23   :  { %p137_p0 = pnand %p136_p13, %p130_p10 }
  0x2c   :  { %v86_v7 = vpop.eup %85 }
  0x2d   :  { %v88_v8 = vpop.eup %87  ;;  %v48_v9 = vmul.f32 0.5, %v86_v7 }
  0x2e   :  { %v49_v10 = vmul.f32 0.5, %v88_v8 }
  0x2f   :  { %v50_v11 = vadd.f32 0.5, %v48_v9 }
  0x30   :  { %v51_v12 = vadd.f32 0.5, %v49_v10 }
  0x31   :  { %v54_v13 = vmul.f32 %v50_v11, %v42_v4 }
  0x32   :  { %v52_v14 = vadd.f32 %v51_v12, %v50_v11  ;;  %v55_v15 = vmul.f32 %v51_v12, %v43_v5 }
  0x34   :  { %57 = vst [vmem:[#allocation7] sm:$0xff] %v52_v14  ;;  %v56_v16 = vadd.f32 %v55_v15, %v54_v13 }
  0x36   :  { %61 = vst [vmem:[#allocation7 + $0x10] sm:$0xff] %v56_v16 }
  0x37   :  { %140 = shalt.err (!%p137_p0)
}
  0x38   :  { %73 = dma.vmem_to_hbm [thread:$0]  %s68_s1, 384, %s195_s2, [#allocation4], %s156_s12, %s156_s12, %s157_s13  }
  0x39   :  { %153 = dma.done.wait [#allocation4], 384  }
  0x3a   :  { %154 = vsyncadd [#allocation4], 4294966912 }
  0x3b   :  { %77 = vsyncpa [#allocation3], 1 }
  0x3c   :  { %78 = vsyncpa [#allocation6], 1 }
  0x3d   :  { %79 = vsyncpa [#allocation4], 1 }

</bundles_post_ra>
